<compile_context>
chip_gen: v6e
topology: v6e:2x2x1
jax: 0.10.0
libtpu: 0.0.40
codegen_flags: <defaults>
</compile_context>

<pallas_src>
import functools

import jax
import jax.numpy as jnp
from jax.experimental import pallas as pl
from jax.experimental.pallas import tpu as pltpu

EPS = 1e-5  # nn.BatchNorm2d default


# --------------------------- kernels ---------------------------

def _conv_stats_kernel(x_ref, w_ref, b_ref, inscale_ref, inshift_ref,
                       y_ref, sum_ref, ssq_ref, *, apply_input_act, H):
    """3x3 SAME conv over one image in the (H, W*C) row-major lane layout.

    x_ref:       (H, W*Cin)        input rows (no halo; height zero-padding is
                                    rebuilt in-kernel with explicit zero rows)
    w_ref:       (3, W*Cin, W*Cout) banded weight slab, one matmul per kh tap
                                    (kw shift + width zero-padding baked in)
    b_ref:       (1, W*Cout)        conv bias, tiled over w
    inscale_ref: (1, W*Cin)         previous-layer BN scale (tiled over w)
    inshift_ref: (1, W*Cin)         previous-layer BN shift
    y_ref:       (H, W*Cout)        raw (pre-BN) conv output
    sum_ref:     (1, W*Cout)        per-image h-reduced sums   (phase-1 BN stats)
    ssq_ref:     (1, W*Cout)        per-image h-reduced sums of squares
    """
    mm_dtype = w_ref.dtype
    x = x_ref[...]

    if apply_input_act:
        # Fused BN(prev layer) affine + ReLU; interior rows only (no halo is
        # stored, so no iota/select masking is needed).
        a = jnp.maximum(x.astype(jnp.float32) * inscale_ref[...] + inshift_ref[...], 0.0)
        a = a.astype(mm_dtype)
    else:
        a = x.astype(mm_dtype)

    # Height zero-padding: shifted row views with an explicit zero row.
    zrow = jnp.zeros((1, a.shape[-1]), mm_dtype)
    up = jnp.concatenate([zrow, a[:H - 1]], axis=0)    # rows h-1 (kh = 0)
    down = jnp.concatenate([a[1:], zrow], axis=0)      # rows h+1 (kh = 2)

    # One MXU matmul per kh tap against the banded slab; f32 accumulation.
    acc = jnp.dot(up, w_ref[0], preferred_element_type=jnp.float32)
    acc = acc + jnp.dot(a, w_ref[1], preferred_element_type=jnp.float32)
    acc = acc + jnp.dot(down, w_ref[2], preferred_element_type=jnp.float32)
    acc = acc + b_ref[...]

    # Phase-1 BatchNorm statistics, taken from the f32 accumulator BEFORE any
    # downcast of y.  The final per-channel reduction (over n and w) is a few
    # scalar-sized ops in the wrapper.
    sum_ref[...] = jnp.sum(acc, axis=0, keepdims=True)
    ssq_ref[...] = jnp.sum(acc * acc, axis=0, keepdims=True)

    y_ref[...] = acc.astype(y_ref.dtype)


def _bn_relu_kernel(y_ref, scale_ref, shift_ref, o_ref):
    """y = ReLU(y * scale + shift), computed in f32, one image per grid step."""
    y = y_ref[...].astype(jnp.float32)
    o_ref[...] = jnp.maximum(y * scale_ref[...] + shift_ref[...], 0.0).astype(o_ref.dtype)


# --------------------------- pallas_call wrappers ---------------------------

def _vmem_limit(streamed_bytes, resident_bytes):
    """Generation-aware VMEM limit: 2x per streamed block (double buffering)
    + 2x resident (grid-invariant, still double-buffered) blocks + headroom,
    clamped to 75% of physical VMEM."""
    try:
        cap = int(pltpu.get_tpu_info().vmem_capacity_bytes)
    except Exception:       # conservative fallback: smallest current VMEM (v7x)
        cap = 64 << 20
    est = 2 * streamed_bytes + 2 * resident_bytes + (8 << 20)
    return int(min(max(est, 32 << 20), (3 * cap) // 4))


def _conv_bn_stats(x, w3, brow, inscale, inshift, *, apply_input_act, out_dtype):
    """Run the conv(+stats) kernel over a batch-parallel grid."""
    N, H, WCi = x.shape
    WCo = w3.shape[-1]
    kernel = functools.partial(
        _conv_stats_kernel, apply_input_act=apply_input_act, H=H)

    streamed = (H * WCi * x.dtype.itemsize
                + H * WCo * jnp.dtype(out_dtype).itemsize
                + 2 * WCo * 4)
    resident = 3 * WCi * WCo * w3.dtype.itemsize + (WCo + 2 * WCi) * 4

    grid_spec = pl.GridSpec(
        grid=(N,),
        in_specs=[
            pl.BlockSpec((None, H, WCi), lambda n: (n, 0, 0)),   # one image
            pl.BlockSpec((3, WCi, WCo), lambda n: (0, 0, 0)),    # banded weights
            pl.BlockSpec((1, WCo), lambda n: (0, 0)),            # bias row
            pl.BlockSpec((1, WCi), lambda n: (0, 0)),            # prev-BN scale
            pl.BlockSpec((1, WCi), lambda n: (0, 0)),            # prev-BN shift
        ],
        out_specs=[
            pl.BlockSpec((None, H, WCo), lambda n: (n, 0, 0)),   # raw conv out
            pl.BlockSpec((None, 1, WCo), lambda n: (n, 0, 0)),   # channel sums
            pl.BlockSpec((None, 1, WCo), lambda n: (n, 0, 0)),   # channel sumsq
        ],
    )
    return pl.pallas_call(
        kernel,
        out_shape=(
            jax.ShapeDtypeStruct((N, H, WCo), out_dtype),
            jax.ShapeDtypeStruct((N, 1, WCo), jnp.float32),
            jax.ShapeDtypeStruct((N, 1, WCo), jnp.float32),
        ),
        grid_spec=grid_spec,
        compiler_params=pltpu.CompilerParams(
            dimension_semantics=("parallel",),
            vmem_limit_bytes=_vmem_limit(streamed, resident)),
    )(x, w3, brow, inscale, inshift)


def _bn_relu_apply(y, scale_row, shift_row):
    """Phase-2 of the final BatchNorm: tiled affine + ReLU."""
    N, H, WC = y.shape
    streamed = H * WC * (y.dtype.itemsize + 4)
    grid_spec = pl.GridSpec(
        grid=(N,),
        in_specs=[
            pl.BlockSpec((None, H, WC), lambda n: (n, 0, 0)),
            pl.BlockSpec((1, WC), lambda n: (0, 0)),
            pl.BlockSpec((1, WC), lambda n: (0, 0)),
        ],
        out_specs=pl.BlockSpec((None, H, WC), lambda n: (n, 0, 0)),
    )
    return pl.pallas_call(
        _bn_relu_kernel,
        out_shape=jax.ShapeDtypeStruct((N, H, WC), jnp.float32),
        grid_spec=grid_spec,
        compiler_params=pltpu.CompilerParams(
            dimension_semantics=("parallel",),
            vmem_limit_bytes=_vmem_limit(streamed, 0)),
    )(y, scale_row, shift_row)


# --------------------------- parameter prep + forward ---------------------------

def _prep_weight(w_oihw, W):
    """(Cout, Cin, 3, 3) -> banded slab (3, W*Cin, W*Cout).

    slab[kh, u*Cin + ci, w*Cout + co] = K[co, ci, kh, u - w + 1] when
    |u - w| <= 1, else 0 — i.e. the kw shift and the zero width-padding of a
    SAME 3x3 conv are folded into the matmul band structure.
    """
    Co, Ci, KH, KW = w_oihw.shape
    wk = jnp.transpose(w_oihw, (2, 3, 1, 0))                 # (kh, kw, ci, co)
    u = jnp.arange(W)[None, :, None]                         # (1, W, 1)
    w = jnp.arange(W)[None, None, :]                         # (1, 1, W)
    kw = jnp.arange(KW)[:, None, None]                       # (KW, 1, 1)
    sel = (u == w + kw - 1).astype(w_oihw.dtype)             # (KW, W, W)
    slab = jnp.einsum("yxio,xuw->yuiwo", wk, sel)            # (KH, W, Ci, W, Co)
    return slab.reshape(KH, W * Ci, W * Co)


@functools.partial(jax.jit, static_argnames=("matmul_dtype",))
def double_conv(x_nchw, params, matmul_dtype=jnp.float32):
    """DoubleConv forward. Input/output layout matches PyTorch: NCHW (f32)."""
    N, Cin, H, W = x_nchw.shape
    Cout = params["w1_oihw"].shape[0]
    cnt = float(N * H * W)

    # NCHW -> (N, H, W*Cin): width folded onto the lane axis, channels minor.
    x = jnp.transpose(x_nchw, (0, 2, 3, 1)).reshape(N, H, W * Cin).astype(jnp.float32)

    w1 = _prep_weight(params["w1_oihw"], W).astype(matmul_dtype)   # (3, W*Cin,  W*Cout)
    w2 = _prep_weight(params["w2_oihw"], W).astype(matmul_dtype)   # (3, W*Cout, W*Cout)
    b1 = jnp.tile(params["b1"], W).reshape(1, W * Cout)
    b2 = jnp.tile(params["b2"], W).reshape(1, W * Cout)

    ones_i = jnp.ones((1, W * Cin), jnp.float32)
    zeros_i = jnp.zeros((1, W * Cin), jnp.float32)

    # ---- conv1 + BN1 partial statistics (phase 1) ----
    y1, s1, ss1 = _conv_bn_stats(x, w1, b1, ones_i, zeros_i,
                                 apply_input_act=False, out_dtype=matmul_dtype)
    mean1 = jnp.sum(s1.reshape(N, W, Cout), axis=(0, 1)) / cnt
    var1 = jnp.maximum(
        jnp.sum(ss1.reshape(N, W, Cout), axis=(0, 1)) / cnt - mean1 * mean1, 0.0)
    scale1 = params["g1"] * jax.lax.rsqrt(var1 + EPS)
    shift1 = params["be1"] - mean1 * scale1
    # TODO(synk): nn.BatchNorm2d also updates running_mean / running_var in
    # training mode; those side-effect buffers are not materialized here.

    # ---- conv2 (BN1 affine + ReLU fused into its prologue) + BN2 stats ----
    y2, s2, ss2 = _conv_bn_stats(
        y1, w2, b2,
        jnp.tile(scale1, W).reshape(1, W * Cout),
        jnp.tile(shift1, W).reshape(1, W * Cout),
        apply_input_act=True, out_dtype=matmul_dtype)
    mean2 = jnp.sum(s2.reshape(N, W, Cout), axis=(0, 1)) / cnt
    var2 = jnp.maximum(
        jnp.sum(ss2.reshape(N, W, Cout), axis=(0, 1)) / cnt - mean2 * mean2, 0.0)
    scale2 = params["g2"] * jax.lax.rsqrt(var2 + EPS)
    shift2 = params["be2"] - mean2 * scale2

    # ---- final BN2 apply + ReLU (tiled elementwise pass) ----
    out = _bn_relu_apply(y2,
                         jnp.tile(scale2, W).reshape(1, W * Cout),
                         jnp.tile(shift2, W).reshape(1, W * Cout))
    # (N, H, W*Cout) -> NCHW; nothing is channel-padded, so this is only the
    # tiny layout transpose (left to XLA).
    return jnp.transpose(out.reshape(N, H, W, Cout), (0, 3, 1, 2))


# --------------------------- init + pure-JAX reference ---------------------------

def init_params(key, in_channels, out_channels):
    ks = jax.random.split(key, 8)
    return {
        "w1_oihw": 0.1 * jax.random.normal(ks[0], (out_channels, in_channels, 3, 3), jnp.float32),
        "w2_oihw": 0.1 * jax.random.normal(ks[1], (out_channels, out_channels, 3, 3), jnp.float32),
        "b1": 0.1 * jax.random.normal(ks[2], (out_channels,), jnp.float32),
        "b2": 0.1 * jax.random.normal(ks[3], (out_channels,), jnp.float32),
        "g1": 1.0 + 0.1 * jax.random.normal(ks[4], (out_channels,), jnp.float32),
        "be1": 0.1 * jax.random.normal(ks[5], (out_channels,), jnp.float32),
        "g2": 1.0 + 0.1 * jax.random.normal(ks[6], (out_channels,), jnp.float32),
        "be2": 0.1 * jax.random.normal(ks[7], (out_channels,), jnp.float32),
    }


def ref_double_conv(x_nchw, params):
    def conv(x, w_oihw, b):
        y = jax.lax.conv_general_dilated(
            x, w_oihw, window_strides=(1, 1), padding="SAME",
            dimension_numbers=("NCHW", "OIHW", "NCHW"))
        return y + b[None, :, None, None]

    def bn_relu(x, g, be):
        mean = jnp.mean(x, axis=(0, 2, 3), keepdims=True)
        var = jnp.mean((x - mean) ** 2, axis=(0, 2, 3), keepdims=True)
        y = (x - mean) * jax.lax.rsqrt(var + EPS)
        y = y * g[None, :, None, None] + be[None, :, None, None]
        return jnp.maximum(y, 0.0)

    y = bn_relu(conv(x_nchw, params["w1_oihw"], params["b1"]), params["g1"], params["be1"])
    y = bn_relu(conv(y, params["w2_oihw"], params["b2"]), params["g2"], params["be2"])
    return y


if __name__ == "__main__":
    key = jax.random.PRNGKey(0)
    kx, kp = jax.random.split(key)

    N, Cin, Cout, H, W = 2, 4, 8, 16, 16
    x = jax.random.normal(kx, (N, Cin, H, W), jnp.float32)   # NCHW, like PyTorch
    params = init_params(kp, Cin, Cout)

    ref = ref_double_conv(x, params)

    # f32 datapath: strict parity with the PyTorch module.
    out = jax.block_until_ready(double_conv(x, params, matmul_dtype=jnp.float32))
    assert out.shape == (N, Cout, H, W), out.shape
    err = float(jnp.max(jnp.abs(out - ref)))
    assert jnp.allclose(out, ref, atol=1e-4, rtol=1e-4), err

    # bf16-staged datapath (MXU-native, half the intermediate HBM traffic).
    # Accumulation stays f32; tolerance is relaxed accordingly — the strict
    # correctness check is carried by the f32 path above.
    out_bf16 = jax.block_until_ready(double_conv(x, params, matmul_dtype=jnp.bfloat16))
    err_bf16 = float(jnp.max(jnp.abs(out_bf16 - ref)))
    assert jnp.allclose(out_bf16, ref, atol=1e-1, rtol=1e-1), err_bf16

    print("KERNEL_OK")
</pallas_src>

<mosaic_0001>
module attributes {stable_mosaic.version = 11 : i64} {
  func.func @_conv_stats_kernel(%arg0: i32, %arg1: memref<1x16x64xf32, #tpu.memory_space<vmem>>, %arg2: memref<3x64x128xf32, #tpu.memory_space<vmem>>, %arg3: memref<1x128xf32, #tpu.memory_space<vmem>>, %arg4: memref<1x64xf32, #tpu.memory_space<vmem>>, %arg5: memref<1x64xf32, #tpu.memory_space<vmem>>, %arg6: memref<1x16x128xf32, #tpu.memory_space<vmem>>, %arg7: memref<1x1x128xf32, #tpu.memory_space<vmem>>, %arg8: memref<1x1x128xf32, #tpu.memory_space<vmem>>) attributes {dimension_semantics = [#tpu.dimension_semantics<parallel>], iteration_bounds = array<i64: 2>, scalar_prefetch = 0 : i64, scratch_operands = 0 : i64, tpu.core_type = #tpu.core_type<tc>, window_params = [{transform_indices = @transform_0, window_bounds = array<i64: 1, 16, 64>}, {pipeline_mode = #tpu.pipeline_mode<synchronous>, transform_indices = @transform_1, window_bounds = array<i64: 3, 64, 128>}, {pipeline_mode = #tpu.pipeline_mode<synchronous>, transform_indices = @transform_2, window_bounds = array<i64: 1, 128>}, {pipeline_mode = #tpu.pipeline_mode<synchronous>, transform_indices = @transform_3, window_bounds = array<i64: 1, 64>}, {pipeline_mode = #tpu.pipeline_mode<synchronous>, transform_indices = @transform_4, window_bounds = array<i64: 1, 64>}, {transform_indices = @transform_5, window_bounds = array<i64: 1, 16, 128>}, {transform_indices = @transform_6, window_bounds = array<i64: 1, 1, 128>}, {transform_indices = @transform_7, window_bounds = array<i64: 1, 1, 128>}]} {
    %c0 = arith.constant 0 : index
    %c0_0 = arith.constant 0 : index
    %c0_1 = arith.constant 0 : index
    %0 = vector.load %arg1[%c0, %c0_0, %c0_1] : memref<1x16x64xf32, #tpu.memory_space<vmem>>, vector<1x16x64xf32>
    %1 = vector.shape_cast %0 : vector<1x16x64xf32> to vector<16x64xf32>
    %cst = arith.constant 0.000000e+00 : f32
    %2 = vector.broadcast %cst : f32 to vector<1x64xf32>
    %3 = vector.extract_strided_slice %1 {offsets = [0, 0], sizes = [15, 64], strides = [1, 1]} : vector<16x64xf32> to vector<15x64xf32>
    %4 = tpu.concatenate %2, %3 in 0 : vector<1x64xf32>, vector<15x64xf32> -> vector<16x64xf32>
    %5 = vector.extract_strided_slice %1 {offsets = [1, 0], sizes = [15, 64], strides = [1, 1]} : vector<16x64xf32> to vector<15x64xf32>
    %6 = tpu.concatenate %5, %2 in 0 : vector<15x64xf32>, vector<1x64xf32> -> vector<16x64xf32>
    %c0_2 = arith.constant 0 : index
    %c0_3 = arith.constant 0 : index
    %c0_4 = arith.constant 0 : index
    %7 = vector.load %arg2[%c0_2, %c0_3, %c0_4] : memref<3x64x128xf32, #tpu.memory_space<vmem>>, vector<1x64x128xf32>
    %8 = vector.shape_cast %7 : vector<1x64x128xf32> to vector<64x128xf32>
    %cst_5 = arith.constant dense<0.000000e+00> : vector<16x128xf32>
    %9 = tpu.matmul %4, %8, %cst_5 {dimension_numbers = #tpu.dot_dimension_numbers<[1], [0], [0], [1], [0, 0, 1, 1], [], []>} : vector<16x64xf32>, vector<64x128xf32>, vector<16x128xf32> -> vector<16x128xf32>
    %c1 = arith.constant 1 : index
    %c0_6 = arith.constant 0 : index
    %c0_7 = arith.constant 0 : index
    %10 = vector.load %arg2[%c1, %c0_6, %c0_7] : memref<3x64x128xf32, #tpu.memory_space<vmem>>, vector<1x64x128xf32>
    %11 = vector.shape_cast %10 : vector<1x64x128xf32> to vector<64x128xf32>
    %cst_8 = arith.constant dense<0.000000e+00> : vector<16x128xf32>
    %12 = tpu.matmul %1, %11, %cst_8 {dimension_numbers = #tpu.dot_dimension_numbers<[1], [0], [0], [1], [0, 0, 1, 1], [], []>} : vector<16x64xf32>, vector<64x128xf32>, vector<16x128xf32> -> vector<16x128xf32>
    %13 = arith.addf %9, %12 : vector<16x128xf32>
    %c2 = arith.constant 2 : index
    %c0_9 = arith.constant 0 : index
    %c0_10 = arith.constant 0 : index
    %14 = vector.load %arg2[%c2, %c0_9, %c0_10] : memref<3x64x128xf32, #tpu.memory_space<vmem>>, vector<1x64x128xf32>
    %15 = vector.shape_cast %14 : vector<1x64x128xf32> to vector<64x128xf32>
    %cst_11 = arith.constant dense<0.000000e+00> : vector<16x128xf32>
    %16 = tpu.matmul %6, %15, %cst_11 {dimension_numbers = #tpu.dot_dimension_numbers<[1], [0], [0], [1], [0, 0, 1, 1], [], []>} : vector<16x64xf32>, vector<64x128xf32>, vector<16x128xf32> -> vector<16x128xf32>
    %17 = arith.addf %13, %16 : vector<16x128xf32>
    %c0_12 = arith.constant 0 : index
    %c0_13 = arith.constant 0 : index
    %18 = vector.load %arg3[%c0_12, %c0_13] : memref<1x128xf32, #tpu.memory_space<vmem>>, vector<1x128xf32>
    %19 = vector.broadcast %18 : vector<1x128xf32> to vector<16x128xf32>
    %20 = arith.addf %17, %19 : vector<16x128xf32>
    %cst_14 = arith.constant dense<0.000000e+00> : vector<128xf32>
    %21 = vector.multi_reduction <add>, %20, %cst_14 [0] : vector<16x128xf32> to vector<128xf32>
    %22 = vector.shape_cast %21 : vector<128xf32> to vector<1x128xf32>
    %c0_15 = arith.constant 0 : index
    %c0_16 = arith.constant 0 : index
    %c0_17 = arith.constant 0 : index
    %23 = vector.load %arg7[%c0_15, %c0_16, %c0_17] : memref<1x1x128xf32, #tpu.memory_space<vmem>>, vector<1x1x128xf32>
    %24 = vector.shape_cast %23 : vector<1x1x128xf32> to vector<1x128xf32>
    %25 = vector.shape_cast %22 : vector<1x128xf32> to vector<1x1x128xf32>
    tpu.vector_store %arg7[%c0_15, %c0_16, %c0_17], %25 {strides = array<i32>} : memref<1x1x128xf32, #tpu.memory_space<vmem>>, vector<1x1x128xf32>,
    %26 = arith.mulf %20, %20 : vector<16x128xf32>
    %cst_18 = arith.constant dense<0.000000e+00> : vector<128xf32>
    %27 = vector.multi_reduction <add>, %26, %cst_18 [0] : vector<16x128xf32> to vector<128xf32>
    %28 = vector.shape_cast %27 : vector<128xf32> to vector<1x128xf32>
    %c0_19 = arith.constant 0 : index
    %c0_20 = arith.constant 0 : index
    %c0_21 = arith.constant 0 : index
    %29 = vector.load %arg8[%c0_19, %c0_20, %c0_21] : memref<1x1x128xf32, #tpu.memory_space<vmem>>, vector<1x1x128xf32>
    %30 = vector.shape_cast %29 : vector<1x1x128xf32> to vector<1x128xf32>
    %31 = vector.shape_cast %28 : vector<1x128xf32> to vector<1x1x128xf32>
    tpu.vector_store %arg8[%c0_19, %c0_20, %c0_21], %31 {strides = array<i32>} : memref<1x1x128xf32, #tpu.memory_space<vmem>>, vector<1x1x128xf32>,
    %c0_22 = arith.constant 0 : index
    %c0_23 = arith.constant 0 : index
    %c0_24 = arith.constant 0 : index
    %32 = vector.load %arg6[%c0_22, %c0_23, %c0_24] : memref<1x16x128xf32, #tpu.memory_space<vmem>>, vector<1x16x128xf32>
    %33 = vector.shape_cast %32 : vector<1x16x128xf32> to vector<16x128xf32>
    %34 = vector.shape_cast %20 : vector<16x128xf32> to vector<1x16x128xf32>
    tpu.vector_store %arg6[%c0_22, %c0_23, %c0_24], %34 {strides = array<i32>} : memref<1x16x128xf32, #tpu.memory_space<vmem>>, vector<1x16x128xf32>,
    return
  }
  func.func @transform_0(%arg0: i32) -> (i32, i32, i32) {
    %c0_i32 = arith.constant 0 : i32
    %c0_i32_0 = arith.constant 0 : i32
    %c0_i32_1 = arith.constant 0 : i32
    return %arg0, %c0_i32, %c0_i32_0 : i32, i32, i32
  }
  func.func @transform_1(%arg0: i32) -> (i32, i32, i32) {
    %c0_i32 = arith.constant 0 : i32
    %c0_i32_0 = arith.constant 0 : i32
    %c0_i32_1 = arith.constant 0 : i32
    %c0_i32_2 = arith.constant 0 : i32
    return %c0_i32, %c0_i32_0, %c0_i32_1 : i32, i32, i32
  }
  func.func @transform_2(%arg0: i32) -> (i32, i32) {
    %c0_i32 = arith.constant 0 : i32
    %c0_i32_0 = arith.constant 0 : i32
    %c0_i32_1 = arith.constant 0 : i32
    return %c0_i32, %c0_i32_0 : i32, i32
  }
  func.func @transform_3(%arg0: i32) -> (i32, i32) {
    %c0_i32 = arith.constant 0 : i32
    %c0_i32_0 = arith.constant 0 : i32
    %c0_i32_1 = arith.constant 0 : i32
    return %c0_i32, %c0_i32_0 : i32, i32
  }
  func.func @transform_4(%arg0: i32) -> (i32, i32) {
    %c0_i32 = arith.constant 0 : i32
    %c0_i32_0 = arith.constant 0 : i32
    %c0_i32_1 = arith.constant 0 : i32
    return %c0_i32, %c0_i32_0 : i32, i32
  }
  func.func @transform_5(%arg0: i32) -> (i32, i32, i32) {
    %c0_i32 = arith.constant 0 : i32
    %c0_i32_0 = arith.constant 0 : i32
    %c0_i32_1 = arith.constant 0 : i32
    return %arg0, %c0_i32, %c0_i32_0 : i32, i32, i32
  }
  func.func @transform_6(%arg0: i32) -> (i32, i32, i32) {
    %c0_i32 = arith.constant 0 : i32
    %c0_i32_0 = arith.constant 0 : i32
    %c0_i32_1 = arith.constant 0 : i32
    return %arg0, %c0_i32, %c0_i32_0 : i32, i32, i32
  }
  func.func @transform_7(%arg0: i32) -> (i32, i32, i32) {
    %c0_i32 = arith.constant 0 : i32
    %c0_i32_0 = arith.constant 0 : i32
    %c0_i32_1 = arith.constant 0 : i32
    return %arg0, %c0_i32, %c0_i32_0 : i32, i32, i32
  }
}

module attributes {stable_mosaic.version = 11 : i64} {
  func.func @_conv_stats_kernel(%arg0: i32, %arg1: memref<1x16x128xf32, #tpu.memory_space<vmem>>, %arg2: memref<3x128x128xf32, #tpu.memory_space<vmem>>, %arg3: memref<1x128xf32, #tpu.memory_space<vmem>>, %arg4: memref<1x128xf32, #tpu.memory_space<vmem>>, %arg5: memref<1x128xf32, #tpu.memory_space<vmem>>, %arg6: memref<1x16x128xf32, #tpu.memory_space<vmem>>, %arg7: memref<1x1x128xf32, #tpu.memory_space<vmem>>, %arg8: memref<1x1x128xf32, #tpu.memory_space<vmem>>) attributes {dimension_semantics = [#tpu.dimension_semantics<parallel>], iteration_bounds = array<i64: 2>, scalar_prefetch = 0 : i64, scratch_operands = 0 : i64, tpu.core_type = #tpu.core_type<tc>, window_params = [{transform_indices = @transform_0, window_bounds = array<i64: 1, 16, 128>}, {pipeline_mode = #tpu.pipeline_mode<synchronous>, transform_indices = @transform_1, window_bounds = array<i64: 3, 128, 128>}, {pipeline_mode = #tpu.pipeline_mode<synchronous>, transform_indices = @transform_2, window_bounds = array<i64: 1, 128>}, {pipeline_mode = #tpu.pipeline_mode<synchronous>, transform_indices = @transform_3, window_bounds = array<i64: 1, 128>}, {pipeline_mode = #tpu.pipeline_mode<synchronous>, transform_indices = @transform_4, window_bounds = array<i64: 1, 128>}, {transform_indices = @transform_5, window_bounds = array<i64: 1, 16, 128>}, {transform_indices = @transform_6, window_bounds = array<i64: 1, 1, 128>}, {transform_indices = @transform_7, window_bounds = array<i64: 1, 1, 128>}]} {
    %c0 = arith.constant 0 : index
    %c0_0 = arith.constant 0 : index
    %c0_1 = arith.constant 0 : index
    %0 = vector.load %arg1[%c0, %c0_0, %c0_1] : memref<1x16x128xf32, #tpu.memory_space<vmem>>, vector<1x16x128xf32>
    %1 = vector.shape_cast %0 : vector<1x16x128xf32> to vector<16x128xf32>
    %c0_2 = arith.constant 0 : index
    %c0_3 = arith.constant 0 : index
    %2 = vector.load %arg4[%c0_2, %c0_3] : memref<1x128xf32, #tpu.memory_space<vmem>>, vector<1x128xf32>
    %3 = vector.broadcast %2 : vector<1x128xf32> to vector<16x128xf32>
    %4 = arith.mulf %1, %3 : vector<16x128xf32>
    %c0_4 = arith.constant 0 : index
    %c0_5 = arith.constant 0 : index
    %5 = vector.load %arg5[%c0_4, %c0_5] : memref<1x128xf32, #tpu.memory_space<vmem>>, vector<1x128xf32>
    %6 = vector.broadcast %5 : vector<1x128xf32> to vector<16x128xf32>
    %7 = arith.addf %4, %6 : vector<16x128xf32>
    %cst = arith.constant 0.000000e+00 : f32
    %8 = vector.broadcast %cst : f32 to vector<16x128xf32>
    %9 = arith.maximumf %7, %8 : vector<16x128xf32>
    %cst_6 = arith.constant 0.000000e+00 : f32
    %10 = vector.broadcast %cst_6 : f32 to vector<1x128xf32>
    %11 = vector.extract_strided_slice %9 {offsets = [0, 0], sizes = [15, 128], strides = [1, 1]} : vector<16x128xf32> to vector<15x128xf32>
    %12 = tpu.concatenate %10, %11 in 0 : vector<1x128xf32>, vector<15x128xf32> -> vector<16x128xf32>
    %13 = vector.extract_strided_slice %9 {offsets = [1, 0], sizes = [15, 128], strides = [1, 1]} : vector<16x128xf32> to vector<15x128xf32>
    %14 = tpu.concatenate %13, %10 in 0 : vector<15x128xf32>, vector<1x128xf32> -> vector<16x128xf32>
    %c0_7 = arith.constant 0 : index
    %c0_8 = arith.constant 0 : index
    %c0_9 = arith.constant 0 : index
    %15 = vector.load %arg2[%c0_7, %c0_8, %c0_9] : memref<3x128x128xf32, #tpu.memory_space<vmem>>, vector<1x128x128xf32>
    %16 = vector.shape_cast %15 : vector<1x128x128xf32> to vector<128x128xf32>
    %cst_10 = arith.constant dense<0.000000e+00> : vector<16x128xf32>
    %17 = tpu.matmul %12, %16, %cst_10 {dimension_numbers = #tpu.dot_dimension_numbers<[1], [0], [0], [1], [0, 0, 1, 1], [], []>} : vector<16x128xf32>, vector<128x128xf32>, vector<16x128xf32> -> vector<16x128xf32>
    %c1 = arith.constant 1 : index
    %c0_11 = arith.constant 0 : index
    %c0_12 = arith.constant 0 : index
    %18 = vector.load %arg2[%c1, %c0_11, %c0_12] : memref<3x128x128xf32, #tpu.memory_space<vmem>>, vector<1x128x128xf32>
    %19 = vector.shape_cast %18 : vector<1x128x128xf32> to vector<128x128xf32>
    %cst_13 = arith.constant dense<0.000000e+00> : vector<16x128xf32>
    %20 = tpu.matmul %9, %19, %cst_13 {dimension_numbers = #tpu.dot_dimension_numbers<[1], [0], [0], [1], [0, 0, 1, 1], [], []>} : vector<16x128xf32>, vector<128x128xf32>, vector<16x128xf32> -> vector<16x128xf32>
    %21 = arith.addf %17, %20 : vector<16x128xf32>
    %c2 = arith.constant 2 : index
    %c0_14 = arith.constant 0 : index
    %c0_15 = arith.constant 0 : index
    %22 = vector.load %arg2[%c2, %c0_14, %c0_15] : memref<3x128x128xf32, #tpu.memory_space<vmem>>, vector<1x128x128xf32>
    %23 = vector.shape_cast %22 : vector<1x128x128xf32> to vector<128x128xf32>
    %cst_16 = arith.constant dense<0.000000e+00> : vector<16x128xf32>
    %24 = tpu.matmul %14, %23, %cst_16 {dimension_numbers = #tpu.dot_dimension_numbers<[1], [0], [0], [1], [0, 0, 1, 1], [], []>} : vector<16x128xf32>, vector<128x128xf32>, vector<16x128xf32> -> vector<16x128xf32>
    %25 = arith.addf %21, %24 : vector<16x128xf32>
    %c0_17 = arith.constant 0 : index
    %c0_18 = arith.constant 0 : index
    %26 = vector.load %arg3[%c0_17, %c0_18] : memref<1x128xf32, #tpu.memory_space<vmem>>, vector<1x128xf32>
    %27 = vector.broadcast %26 : vector<1x128xf32> to vector<16x128xf32>
    %28 = arith.addf %25, %27 : vector<16x128xf32>
    %cst_19 = arith.constant dense<0.000000e+00> : vector<128xf32>
    %29 = vector.multi_reduction <add>, %28, %cst_19 [0] : vector<16x128xf32> to vector<128xf32>
    %30 = vector.shape_cast %29 : vector<128xf32> to vector<1x128xf32>
    %c0_20 = arith.constant 0 : index
    %c0_21 = arith.constant 0 : index
    %c0_22 = arith.constant 0 : index
    %31 = vector.load %arg7[%c0_20, %c0_21, %c0_22] : memref<1x1x128xf32, #tpu.memory_space<vmem>>, vector<1x1x128xf32>
    %32 = vector.shape_cast %31 : vector<1x1x128xf32> to vector<1x128xf32>
    %33 = vector.shape_cast %30 : vector<1x128xf32> to vector<1x1x128xf32>
    tpu.vector_store %arg7[%c0_20, %c0_21, %c0_22], %33 {strides = array<i32>} : memref<1x1x128xf32, #tpu.memory_space<vmem>>, vector<1x1x128xf32>,
    %34 = arith.mulf %28, %28 : vector<16x128xf32>
    %cst_23 = arith.constant dense<0.000000e+00> : vector<128xf32>
    %35 = vector.multi_reduction <add>, %34, %cst_23 [0] : vector<16x128xf32> to vector<128xf32>
    %36 = vector.shape_cast %35 : vector<128xf32> to vector<1x128xf32>
    %c0_24 = arith.constant 0 : index
    %c0_25 = arith.constant 0 : index
    %c0_26 = arith.constant 0 : index
    %37 = vector.load %arg8[%c0_24, %c0_25, %c0_26] : memref<1x1x128xf32, #tpu.memory_space<vmem>>, vector<1x1x128xf32>
    %38 = vector.shape_cast %37 : vector<1x1x128xf32> to vector<1x128xf32>
    %39 = vector.shape_cast %36 : vector<1x128xf32> to vector<1x1x128xf32>
    tpu.vector_store %arg8[%c0_24, %c0_25, %c0_26], %39 {strides = array<i32>} : memref<1x1x128xf32, #tpu.memory_space<vmem>>, vector<1x1x128xf32>,
    %c0_27 = arith.constant 0 : index
    %c0_28 = arith.constant 0 : index
    %c0_29 = arith.constant 0 : index
    %40 = vector.load %arg6[%c0_27, %c0_28, %c0_29] : memref<1x16x128xf32, #tpu.memory_space<vmem>>, vector<1x16x128xf32>
    %41 = vector.shape_cast %40 : vector<1x16x128xf32> to vector<16x128xf32>
    %42 = vector.shape_cast %28 : vector<16x128xf32> to vector<1x16x128xf32>
    tpu.vector_store %arg6[%c0_27, %c0_28, %c0_29], %42 {strides = array<i32>} : memref<1x16x128xf32, #tpu.memory_space<vmem>>, vector<1x16x128xf32>,
    return
  }
  func.func @transform_0(%arg0: i32) -> (i32, i32, i32) {
    %c0_i32 = arith.constant 0 : i32
    %c0_i32_0 = arith.constant 0 : i32
    %c0_i32_1 = arith.constant 0 : i32
    return %arg0, %c0_i32, %c0_i32_0 : i32, i32, i32
  }
  func.func @transform_1(%arg0: i32) -> (i32, i32, i32) {
    %c0_i32 = arith.constant 0 : i32
    %c0_i32_0 = arith.constant 0 : i32
    %c0_i32_1 = arith.constant 0 : i32
    %c0_i32_2 = arith.constant 0 : i32
    return %c0_i32, %c0_i32_0, %c0_i32_1 : i32, i32, i32
  }
  func.func @transform_2(%arg0: i32) -> (i32, i32) {
    %c0_i32 = arith.constant 0 : i32
    %c0_i32_0 = arith.constant 0 : i32
    %c0_i32_1 = arith.constant 0 : i32
    return %c0_i32, %c0_i32_0 : i32, i32
  }
  func.func @transform_3(%arg0: i32) -> (i32, i32) {
    %c0_i32 = arith.constant 0 : i32
    %c0_i32_0 = arith.constant 0 : i32
    %c0_i32_1 = arith.constant 0 : i32
    return %c0_i32, %c0_i32_0 : i32, i32
  }
  func.func @transform_4(%arg0: i32) -> (i32, i32) {
    %c0_i32 = arith.constant 0 : i32
    %c0_i32_0 = arith.constant 0 : i32
    %c0_i32_1 = arith.constant 0 : i32
    return %c0_i32, %c0_i32_0 : i32, i32
  }
  func.func @transform_5(%arg0: i32) -> (i32, i32, i32) {
    %c0_i32 = arith.constant 0 : i32
    %c0_i32_0 = arith.constant 0 : i32
    %c0_i32_1 = arith.constant 0 : i32
    return %arg0, %c0_i32, %c0_i32_0 : i32, i32, i32
  }
  func.func @transform_6(%arg0: i32) -> (i32, i32, i32) {
    %c0_i32 = arith.constant 0 : i32
    %c0_i32_0 = arith.constant 0 : i32
    %c0_i32_1 = arith.constant 0 : i32
    return %arg0, %c0_i32, %c0_i32_0 : i32, i32, i32
  }
  func.func @transform_7(%arg0: i32) -> (i32, i32, i32) {
    %c0_i32 = arith.constant 0 : i32
    %c0_i32_0 = arith.constant 0 : i32
    %c0_i32_1 = arith.constant 0 : i32
    return %arg0, %c0_i32, %c0_i32_0 : i32, i32, i32
  }
}

module attributes {stable_mosaic.version = 11 : i64} {
  func.func @_bn_relu_kernel(%arg0: i32, %arg1: memref<1x16x128xf32, #tpu.memory_space<vmem>>, %arg2: memref<1x128xf32, #tpu.memory_space<vmem>>, %arg3: memref<1x128xf32, #tpu.memory_space<vmem>>, %arg4: memref<1x16x128xf32, #tpu.memory_space<vmem>>) attributes {dimension_semantics = [#tpu.dimension_semantics<parallel>], iteration_bounds = array<i64: 2>, scalar_prefetch = 0 : i64, scratch_operands = 0 : i64, tpu.core_type = #tpu.core_type<tc>, window_params = [{transform_indices = @transform_0, window_bounds = array<i64: 1, 16, 128>}, {pipeline_mode = #tpu.pipeline_mode<synchronous>, transform_indices = @transform_1, window_bounds = array<i64: 1, 128>}, {pipeline_mode = #tpu.pipeline_mode<synchronous>, transform_indices = @transform_2, window_bounds = array<i64: 1, 128>}, {transform_indices = @transform_3, window_bounds = array<i64: 1, 16, 128>}]} {
    %c0 = arith.constant 0 : index
    %c0_0 = arith.constant 0 : index
    %c0_1 = arith.constant 0 : index
    %0 = vector.load %arg1[%c0, %c0_0, %c0_1] : memref<1x16x128xf32, #tpu.memory_space<vmem>>, vector<1x16x128xf32>
    %1 = vector.shape_cast %0 : vector<1x16x128xf32> to vector<16x128xf32>
    %c0_2 = arith.constant 0 : index
    %c0_3 = arith.constant 0 : index
    %2 = vector.load %arg2[%c0_2, %c0_3] : memref<1x128xf32, #tpu.memory_space<vmem>>, vector<1x128xf32>
    %3 = vector.broadcast %2 : vector<1x128xf32> to vector<16x128xf32>
    %4 = arith.mulf %1, %3 : vector<16x128xf32>
    %c0_4 = arith.constant 0 : index
    %c0_5 = arith.constant 0 : index
    %5 = vector.load %arg3[%c0_4, %c0_5] : memref<1x128xf32, #tpu.memory_space<vmem>>, vector<1x128xf32>
    %6 = vector.broadcast %5 : vector<1x128xf32> to vector<16x128xf32>
    %7 = arith.addf %4, %6 : vector<16x128xf32>
    %cst = arith.constant 0.000000e+00 : f32
    %8 = vector.broadcast %cst : f32 to vector<16x128xf32>
    %9 = arith.maximumf %7, %8 : vector<16x128xf32>
    %c0_6 = arith.constant 0 : index
    %c0_7 = arith.constant 0 : index
    %c0_8 = arith.constant 0 : index
    %10 = vector.load %arg4[%c0_6, %c0_7, %c0_8] : memref<1x16x128xf32, #tpu.memory_space<vmem>>, vector<1x16x128xf32>
    %11 = vector.shape_cast %10 : vector<1x16x128xf32> to vector<16x128xf32>
    %12 = vector.shape_cast %9 : vector<16x128xf32> to vector<1x16x128xf32>
    tpu.vector_store %arg4[%c0_6, %c0_7, %c0_8], %12 {strides = array<i32>} : memref<1x16x128xf32, #tpu.memory_space<vmem>>, vector<1x16x128xf32>,
    return
  }
  func.func @transform_0(%arg0: i32) -> (i32, i32, i32) {
    %c0_i32 = arith.constant 0 : i32
    %c0_i32_0 = arith.constant 0 : i32
    %c0_i32_1 = arith.constant 0 : i32
    return %arg0, %c0_i32, %c0_i32_0 : i32, i32, i32
  }
  func.func @transform_1(%arg0: i32) -> (i32, i32) {
    %c0_i32 = arith.constant 0 : i32
    %c0_i32_0 = arith.constant 0 : i32
    %c0_i32_1 = arith.constant 0 : i32
    return %c0_i32, %c0_i32_0 : i32, i32
  }
  func.func @transform_2(%arg0: i32) -> (i32, i32) {
    %c0_i32 = arith.constant 0 : i32
    %c0_i32_0 = arith.constant 0 : i32
    %c0_i32_1 = arith.constant 0 : i32
    return %c0_i32, %c0_i32_0 : i32, i32
  }
  func.func @transform_3(%arg0: i32) -> (i32, i32, i32) {
    %c0_i32 = arith.constant 0 : i32
    %c0_i32_0 = arith.constant 0 : i32
    %c0_i32_1 = arith.constant 0 : i32
    return %arg0, %c0_i32, %c0_i32_0 : i32, i32, i32
  }
}

</mosaic_0001>

<bundles_post_ra>
// kernel: tile.33
= control target key start
LH: loop header
LB: loop body
LE: loop exit
PB: predicated region body
PF: predicated region fallthrough
CT: control target
= control target key end

     0   :  { %s28_s0 = inlined_call_operand.vmem [shape: f32[8], index: 0, kind: input, shape index: {}]   ;;  %s29_s1 = inlined_call_operand.vmem [shape: f32[16,8], index: 1, kind: output, shape index: {}]  }
   0x1   :  { %v4_v0 = vld [vmem:[%s28_s0] ss:$0 sm:$0xff] }
   0x2   :  { %5 = vst [vmem:[%s29_s1] sm:$0xff] %v4_v0  ;;  %8 = vst [vmem:[%s29_s1 + $0x8] sm:$0xff] %v4_v0 }

// kernel: tile.34
= control target key start
LH: loop header
LB: loop body
LE: loop exit
PB: predicated region body
PF: predicated region fallthrough
CT: control target
= control target key end

     0   :  { %s133_s10 = smov 120   ;;  %s134_s11 = smov 104   ;;  %vm3_vm0 = vcmask 64512   ;;  %vm9_vm1 = vcmask 1048512   ;;  %vm15_vm2 = vcmask 982912   ;;  %vm21_vm3 = vcmask 917312   ;;  %s209_s0 = inlined_call_operand.vmem [shape: f32[16,8], index: 0, kind: input, shape index: {}]   ;;  %s210_s1 = inlined_call_operand.vmem [shape: f32[1,128], index: 1, kind: output, shape index: {}]  }
   0x1   :  { %v103_v0 = vld [vmem:[%s209_s0 + $0xf] sm:$0x1]   ;;  %v105_v1 = vld [vmem:[%s209_s0 + $0xd] sm:$0x1]   ;;  %v104_v2 = vld [vmem:[%s209_s0 + $0xe] sm:$0x1]  }
   0x2   :  { %7 = vrot.lane.b32.xlu0 %v103_v0, %s133_s10  ;;  %19 = vrot.lane.b32.xlu1 %v105_v1, %s134_s11  ;;  %v106_v3 = vld [vmem:[%s209_s0 + $0xc] sm:$0x1]   ;;  %s135_s16 = smov 112   ;;  %s136_s17 = smov 96   ;;  %v107_v4 = vld [vmem:[%s209_s0 + $0xb] sm:$0x1]  }
   0x3   :  { %v108_v5 = vld [vmem:[%s209_s0 + $0xa] sm:$0x1]   ;;  %v2_v6 = vld [vmem:[%s209_s0] sm:$0x1]   ;;  %s137_s24 = smov 88   ;;  %s138_s25 = smov 80  }
   0x4   :  { %4 = vst.msk [vmem:[#allocation0] sm:$0x1] %vm3_vm0, %v2_v6   ;;  %v109_v7 = vld [vmem:[%s209_s0 + $0x9] sm:$0x1]   ;;  %v110_v8 = vld [vmem:[%s209_s0 + $0x8] sm:$0x1]  }
   0x5   :  { %s139_s30 = smov 72   ;;  %s140_s2 = smov 64   ;;  %v111_v9 = vld [vmem:[%s209_s0 + $0x7] sm:$0x1]   ;;  %v112_v10 = vld [vmem:[%s209_s0 + $0x6] sm:$0x1]  }
   0x6   :  { %13 = vrot.lane.b32.xlu0 %v104_v2, %s135_s16  ;;  %25 = vrot.lane.b32.xlu1 %v106_v3, %s136_s17  ;;  %s141_s7 = smov 56   ;;  %s142_s8 = smov 48   ;;  %v113_v11 = vld [vmem:[%s209_s0 + $0x5] sm:$0x1]   ;;  %v114_v12 = vld [vmem:[%s209_s0 + $0x4] sm:$0x1]  }
   0x7   :  { %s143_s13 = smov 40   ;;  %s144_s14 = smov 32   ;;  %v115_v13 = vld [vmem:[%s209_s0 + $0x3] sm:$0x1]   ;;  %v116_v14 = vld [vmem:[%s209_s0 + $0x2] sm:$0x1]  }
   0x8   :  { %s145_s19 = smov 24   ;;  %s146_s20 = smov 16   ;;  %v117_v15 = vld [vmem:[%s209_s0 + $0x1] sm:$0x1]   ;;  %vm27_vm4 = vcmask 851712   ;;  %vm33_vm5 = vcmask 786112  }
   0x9   :  { %s147_s0 = smov 8   ;;  %vm39_vm6 = vcmask 720512   ;;  %vm45_vm7 = vcmask 654912   ;;  %vm51_vm8 = vcmask 589312   ;;  %vm57_vm9 = vcmask 523712  }
   0xa   :  { %31 = vrot.lane.b32.xlu0 %v107_v4, %s137_s24  ;;  %37 = vrot.lane.b32.xlu1 %v108_v5, %s138_s25  ;;  %vm63_vm10 = vcmask 458112   ;;  %vm69_vm11 = vcmask 392512   ;;  %vm75_vm12 = vcmask 326912   ;;  %vm81_vm13 = vcmask 261312  }
   0xb   :  { %vm87_vm14 = vcmask 195712   ;;  %vm93_vm15 = vcmask 130112  }
   0xe   :  { %43 = vrot.lane.b32.xlu0 %v109_v7, %s139_s30  ;;  %49 = vrot.lane.b32.xlu1 %v110_v8, %s140_s2 }
  0x12   :  { %55 = vrot.lane.b32.xlu0 %v111_v9, %s141_s7  ;;  %61 = vrot.lane.b32.xlu1 %v112_v10, %s142_s8 }
  0x16   :  { %67 = vrot.lane.b32.xlu0 %v113_v11, %s143_s13  ;;  %73 = vrot.lane.b32.xlu1 %v114_v12, %s144_s14 }
  0x1a   :  { %79 = vrot.lane.b32.xlu0 %v115_v13, %s145_s19  ;;  %85 = vrot.lane.b32.xlu1 %v116_v14, %s146_s20 }
  0x1e   :  { %91 = vrot.lane.b32.xlu0 %v117_v15, %s147_s0 }
  0x74   :  { %v8_v16 = vpop.permute.xlu0 %7   ;;  %v20_v17 = vpop.permute.xlu1 %19  }
  0x75   :  { %10 = vst.msk [vmem:[#allocation0] sm:$0x1] %vm9_vm1, %v8_v16  }
  0x78   :  { %v14_v18 = vpop.permute.xlu0 %13   ;;  %v26_v19 = vpop.permute.xlu1 %25  }
  0x79   :  { %16 = vst.msk [vmem:[#allocation0] sm:$0x1] %vm15_vm2, %v14_v18  }
  0x7a   :  { %22 = vst.msk [vmem:[#allocation0] sm:$0x1] %vm21_vm3, %v20_v17  }
  0x7b   :  { %28 = vst.msk [vmem:[#allocation0] sm:$0x1] %vm27_vm4, %v26_v19  }
  0x7c   :  { %v32_v20 = vpop.permute.xlu0 %31   ;;  %v38_v21 = vpop.permute.xlu1 %37  }
  0x7d   :  { %34 = vst.msk [vmem:[#allocation0] sm:$0x1] %vm33_vm5, %v32_v20  }
  0x7e   :  { %40 = vst.msk [vmem:[#allocation0] sm:$0x1] %vm39_vm6, %v38_v21  }
  0x80   :  { %v44_v22 = vpop.permute.xlu0 %43   ;;  %v50_v23 = vpop.permute.xlu1 %49  }
  0x81   :  { %46 = vst.msk [vmem:[#allocation0] sm:$0x1] %vm45_vm7, %v44_v22  }
  0x82   :  { %52 = vst.msk [vmem:[#allocation0] sm:$0x1] %vm51_vm8, %v50_v23  }
  0x84   :  { %v56_v24 = vpop.permute.xlu0 %55   ;;  %v62_v25 = vpop.permute.xlu1 %61  }
  0x85   :  { %58 = vst.msk [vmem:[#allocation0] sm:$0x1] %vm57_vm9, %v56_v24  }
  0x86   :  { %64 = vst.msk [vmem:[#allocation0] sm:$0x1] %vm63_vm10, %v62_v25  }
  0x88   :  { %v68_v26 = vpop.permute.xlu0 %67   ;;  %v74_v27 = vpop.permute.xlu1 %73  }
  0x89   :  { %70 = vst.msk [vmem:[#allocation0] sm:$0x1] %vm69_vm11, %v68_v26  }
  0x8a   :  { %76 = vst.msk [vmem:[#allocation0] sm:$0x1] %vm75_vm12, %v74_v27  }
  0x8c   :  { %v80_v28 = vpop.permute.xlu0 %79   ;;  %v86_v29 = vpop.permute.xlu1 %85  }
  0x8d   :  { %82 = vst.msk [vmem:[#allocation0] sm:$0x1] %vm81_vm13, %v80_v28  }
  0x8e   :  { %88 = vst.msk [vmem:[#allocation0] sm:$0x1] %vm87_vm14, %v86_v29  }
  0x90   :  { %v92_v30 = vpop.permute.xlu0 %91  }
  0x91   :  { %94 = vst.msk [vmem:[#allocation0] sm:$0x1] %vm93_vm15, %v92_v30  }
  0x98   :  { %v99_v31 = vld [vmem:[#allocation0] sm:$0x1] }
  0x99   :  { %102 = vst [vmem:[%s210_s1] sm:$0x1] %v99_v31 }

// kernel: double_conv.3
= control target key start
LH: loop header
LB: loop body
LE: loop exit
PB: predicated region body
PF: predicated region fallthrough
CT: control target
= control target key end

     0   :  { %s893_s24 = smov 0   ;;  %s1010_s0 = inlined_call_operand.vmem [shape: f32[2,16,64], index: 0, kind: input, shape index: {}]   ;;  %s1011_s1 = inlined_call_operand.vmem [shape: f32[3,64,128], index: 1, kind: input, shape index: {}]   ;;  %s1012_s2 = inlined_call_operand.vmem [shape: f32[1,128], index: 2, kind: input, shape index: {}]   ;;  %s1013_s3 = inlined_call_operand.vmem [shape: f32[1,64], index: 3, kind: input, shape index: {}]   ;;  %s1014_s4 = inlined_call_operand.vmem [shape: f32[1,64], index: 4, kind: input, shape index: {}]   ;;  %s1015_s5 = inlined_call_operand.vmem [shape: f32[2,16,128], index: 5, kind: output, shape index: {0}]   ;;  %s1016_s6 = inlined_call_operand.vmem [shape: f32[2,1,128], index: 6, kind: output, shape index: {1}]   ;;  %s1017_s7 = inlined_call_operand.vmem [shape: f32[2,1,128], index: 7, kind: output, shape index: {2}]  }
   0x1 LB: > { %s714_s3 = sadd.s32 4294967295, %s851_s24   ;;  %p718_p0 = scmp.ge.s32.totalorder %s851_s24, 1  ;;  %s851_s24 = sphi %s893_s24, %s18_s24  }
   0x2   : > { %p242_p1 = scmp.lt.s32.totalorder %s851_s24, 3 }
   0x4   : > { %p243_p2 = pnand %p718_p0, %p242_p1 }
   0x5   : > { %p280_p3 = scmp.lt.s32.totalorder (!%p243_p2), %s714_s3, 1 }
   0x6   : > { %246 = sbr.rel (%p243_p2) target bundleno = 262 (0x106), region = 40 }
   0xb   : > { %v730_v0 = vld [vmem:[%s1011_s1 + $0x78] sm:$0xff]  ;;  %v729_v2 = vld [vmem:[%s1011_s1 + $0x70] sm:$0xff]  ;;  %v728_v4 = vld [vmem:[%s1011_s1 + $0x68] sm:$0xff]  ;;  %s1019_s3 = smov (!%p280_p3, %s714_s3), 1  ;;  %vm300_vm0 = vcmask 1040384   ;;  %vm329_vm1 = vcmask 523264  }
   0xc   : > { %v319_v1 = vld [vmem:[%s1011_s1 + $0x38] sm:$0xff]  ;;  %780 = vmatprep.subr.mxu0 %v730_v0  ;;  %v318_v3 = vld [vmem:[%s1011_s1 + $0x30] sm:$0xff]  ;;  %v317_v5 = vld [vmem:[%s1011_s1 + $0x28] sm:$0xff]  ;;  %s748_s17 = sshll.u32 %s1019_s3, 4  ;;  %vm306_vm2 = vcmask 1046528   ;;  %s292_s14 = scalar_lea.vmem %s1016_s6, %s1019_s3 }
   0xd   : > { %799 = vmatprep.subr.mxu1 %v319_v1  ;;  %781 = vmatpush3.msra.mxu0 %v730_v0  ;;  %v727_v6 = vld [vmem:[%s1011_s1 + $0x60] sm:$0xff]  ;;  %s284_s20 = scalar_lea.vmem %s1010_s0, %s748_s17  ;;  %v726_v8 = vld [vmem:[%s1011_s1 + $0x58] sm:$0xff]  ;;  %v725_v11 = vld [vmem:[%s1011_s1 + $0x50] sm:$0xff]  ;;  %s289_s12 = scalar_lea.vmem %s1015_s5, %s748_s17 }
   0xe   : > { %800 = vmatpush3.msra.mxu1 %v319_v1  ;;  %782 = vmatprep.subr.mxu0 %v729_v2  ;;  %v316_v7 = vld [vmem:[%s1011_s1 + $0x20] sm:$0xff]  ;;  %v315_v9 = vld [vmem:[%s1011_s1 + $0x18] sm:$0xff]  ;;  %v314_v12 = vld [vmem:[%s1011_s1 + $0x10] sm:$0xff]  ;;  %s295_s18 = scalar_lea.vmem %s1017_s7, %s1019_s3 }
   0xf   : > { %801 = vmatprep.subr.mxu1 %v318_v3  ;;  %783 = vmatpush3.msra.mxu0 %v729_v2  ;;  %v296_v10 = vld [vmem:[%s284_s20] sm:$0xff]  ;;  %v297_v13 = vld [vmem:[%s284_s20 + $0x8] sm:$0xff]  ;;  %v742_v24 = vld [vmem:[%s1011_s1 + $0xb8] sm:$0xff] }
  0x10   : > { %802 = vmatpush3.msra.mxu1 %v318_v3  ;;  %784 = vmatprep.subr.mxu0 %v728_v4  ;;  %v724_v14 = vld [vmem:[%s1011_s1 + $0x48] sm:$0xff]  ;;  %v301_v16 = vrot.slane %v296_v10, 7  ;;  %v302_v17 = vrot.slane %v297_v13, 7  ;;  %v723_v18 = vld [vmem:[%s1011_s1 + $0x40] sm:$0xff]  ;;  %v307_v20 = vrot.slane %v296_v10, 1  ;;  %v308_v21 = vrot.slane %v297_v13, 1 }
  0x11   : > { %803 = vmatprep.subr.mxu1 %v317_v5  ;;  %785 = vmatpush3.msra.mxu0 %v728_v4  ;;  %v313_v15 = vld [vmem:[%s1011_s1 + $0x8] sm:$0xff]  ;;  %v312_v19 = vld [vmem:[%s1011_s1] sm:$0xff]  ;;  %v741_v26 = vld [vmem:[%s1011_s1 + $0xb0] sm:$0xff] }
  0x12   : > { %804 = vmatpush3.msra.mxu1 %v317_v5  ;;  %786 = vmatprep.subr.mxu0 %v727_v6  ;;  %v305_v22 = vsel %vm300_vm0, 0.0, %v301_v16  ;;  %v303_v23 = vsel %vm300_vm0, %v301_v16, %v302_v17  ;;  %v309_v25 = vsel %vm306_vm2, %v307_v20, %v308_v21  ;;  %v740_v27 = vld [vmem:[%s1011_s1 + $0xa8] sm:$0xff]  ;;  %v739_v28 = vld [vmem:[%s1011_s1 + $0xa0] sm:$0xff]  ;;  %v738_v29 = vld [vmem:[%s1011_s1 + $0x98] sm:$0xff]  ;;  %v311_v33 = vsel %vm306_vm2, %v308_v21, 0.0 }
  0x13   : > { %805 = vmatprep.subr.mxu1 %v316_v7  ;;  %787 = vmatpush3.msra.mxu0 %v727_v6  ;;  %v737_v30 = vld [vmem:[%s1011_s1 + $0x90] sm:$0xff]  ;;  %v736_v31 = vld [vmem:[%s1011_s1 + $0x88] sm:$0xff]  ;;  %v735_v32 = vld [vmem:[%s1011_s1 + $0x80] sm:$0xff] }
  0x14   : > { %806 = vmatpush3.msra.mxu1 %v316_v7  ;;  %788 = vmatprep.subr.mxu0 %v726_v8  ;;  %v745_v40 = vld [vmem:[%s1012_s2] ss:$0 sm:$0xff] }
  0x15   : > { %807 = vmatprep.subr.mxu1 %v315_v9  ;;  %789 = vmatpush3.msra.mxu0 %v726_v8 }
  0x16   : > { %808 = vmatpush3.msra.mxu1 %v315_v9  ;;  %790 = vmatprep.subr.mxu0 %v725_v11 }
  0x17   : > { %809 = vmatprep.subr.mxu1 %v314_v12  ;;  %791 = vmatpush3.msra.mxu0 %v725_v11 }
  0x18   : > { %810 = vmatpush3.msra.mxu1 %v314_v12  ;;  %792 = vmatprep.subr.mxu0 %v724_v14 }
  0x19   : > { %811 = vmatprep.subr.mxu1 %v313_v15  ;;  %793 = vmatpush3.msra.mxu0 %v724_v14 }
  0x1a   : > { %812 = vmatpush3.msra.mxu1 %v313_v15  ;;  %794 = vmatprep.subr.mxu0 %v723_v18 }
  0x1b   : > { %813 = vmatprep.subr.mxu1 %v312_v19  ;;  %795 = vmatpush3.msra.mxu0 %v723_v18 }
  0x1c   : > { %796 = vmatprep.mubr.msk.f32.mxu0 %vm329_vm1, %v296_v10  ;;  %814 = vmatpush3.msra.mxu1 %v312_v19 }
  0x1d   : > { %815 = vmatprep.mubr.msk.f32.mxu1 %vm329_vm1, %v305_v22  ;;  %797 = vmatmul.mubr.msk.f32.vlgmr.msra.gmra.mxu0 %vm329_vm1, %v297_v13 }
  0x1e   : > { %816 = vmatmul.mubr.msk.f32.vlgmr.msra.gmra.mxu1 %vm329_vm1, %v303_v23  ;;  %818 = vmatprep.subr.mxu0 %v742_v24 }
  0x1f   : > { %834 = vmatprep.mubr.msk.f32.mxu0 %vm329_vm1, %v309_v25  ;;  %819 = vmatpush3.msra.mxu0 %v742_v24 }
  0x20   : > { %820 = vmatprep.subr.mxu0 %v741_v26 }
  0x21   : > { %821 = vmatpush3.msra.mxu0 %v741_v26 }
  0x22   : > { %822 = vmatprep.subr.mxu0 %v740_v27 }
  0x23   : > { %823 = vmatpush3.msra.mxu0 %v740_v27 }
  0x24   : > { %824 = vmatprep.subr.mxu0 %v739_v28 }
  0x25   : > { %825 = vmatpush3.msra.mxu0 %v739_v28 }
  0x26   : > { %826 = vmatprep.subr.mxu0 %v738_v29 }
  0x27   : > { %827 = vmatpush3.msra.mxu0 %v738_v29 }
  0x28   : > { %828 = vmatprep.subr.mxu0 %v737_v30 }
  0x29   : > { %829 = vmatpush3.msra.mxu0 %v737_v30 }
  0x2a   : > { %830 = vmatprep.subr.mxu0 %v736_v31 }
  0x2b   : > { %831 = vmatpush3.msra.mxu0 %v736_v31 }
  0x2c   : > { %832 = vmatprep.subr.mxu0 %v735_v32 }
  0x2d   : > { %833 = vmatpush3.msra.mxu0 %v735_v32 }
  0x2e   : > { %835 = vmatmul.mubr.msk.f32.vlgmr.msra.gmra.mxu0 %vm329_vm1, %v311_v33 }
  0xdd   : > { %v798_v34 = vpop.f32.mrf.mxu0 }
  0xde   : > { %v817_v35 = vpop.f32.mrf.mxu1 }
  0xdf   : > { %v400_v36 = vpop.f32.mrf.mxu0  ;;  %v486_v38 = vadd.f32 %v817_v35, %v798_v34 }
  0xe0   : > { %v480_v37 = vpop.f32.mrf.mxu1 }
  0xe1   : > { %v481_v41 = vadd.f32 %v480_v37, %v400_v36 }
  0xee   : > { %v836_v39 = vpop.f32.mrf.mxu0 }
  0xef   : > { %v579_v42 = vadd.f32 %v836_v39, %v486_v38 }
  0xf0   : > { %v569_v43 = vpop.f32.mrf.mxu0 }
  0xf1   : > { %v588_v44 = vadd.f32 %v745_v40, %v579_v42  ;;  %v578_v45 = vadd.f32 %v569_v43, %v481_v41 }
  0xf3   : > { %608 = vst [vmem:[%s289_s12 + $0x8] sm:$0xff] %v588_v44  ;;  %v587_v46 = vadd.f32 %v745_v40, %v578_v45  ;;  %v598_v47 = vmul.f32 %v588_v44, %v588_v44 }
  0xf5   : > { %v589_v48 = vadd.f32 %v588_v44, %v587_v46  ;;  %v597_v49 = vmul.f32 %v587_v46, %v587_v46  ;;  %607 = vst [vmem:[%s289_s12] sm:$0xff] %v587_v46 }
  0xf7   : > { %v590_v50 = vrot.slane %v589_v48, 4  ;;  %v599_v51 = vadd.f32 %v598_v47, %v597_v49 }
  0xf9   : > { %v591_v52 = vadd.f32 %v590_v50, %v589_v48  ;;  %v600_v53 = vrot.slane %v599_v51, 4 }
  0xfb   : > { %v592_v54 = vrot.slane %v591_v52, 2  ;;  %v601_v55 = vadd.f32 %v600_v53, %v599_v51 }
  0xfd   : > { %v593_v56 = vadd.f32 %v592_v54, %v591_v52  ;;  %v602_v57 = vrot.slane %v601_v55, 2 }
  0xff   : > { %v594_v58 = vrot.slane %v593_v56, 1  ;;  %v603_v59 = vadd.f32 %v602_v57, %v601_v55 }
 0x101   : > { %v595_v60 = vadd.f32 %v594_v58, %v593_v56  ;;  %v604_v61 = vrot.slane %v603_v59, 1 }
 0x103   : > { %596 = vst [vmem:[%s292_s14] sm:$0x1] %v595_v60  ;;  %v605_v62 = vadd.f32 %v604_v61, %v603_v59 }
 0x105   : > { %606 = vst [vmem:[%s295_s18] sm:$0x1] %v605_v62 }
 0x106 PF: > { %s18_s24 = sadd.s32 1, %s851_s24  }
 0x107   : > { %p15_p4 = scmp.ge.s32.totalorder %s18_s24, 4  }
 0x109   :  { %17 = sbr.rel (!%p15_p4) target bundleno = 1 (0x1), region = 96 }

// kernel: double_conv.4
= control target key start
LH: loop header
LB: loop body
LE: loop exit
PB: predicated region body
PF: predicated region fallthrough
CT: control target
= control target key end

     0   :  { %s1011_s24 = smov 0   ;;  %s1209_s0 = inlined_call_operand.vmem [shape: f32[2,16,128], index: 0, kind: input, shape index: {}]   ;;  %s1210_s1 = inlined_call_operand.vmem [shape: f32[3,128,128], index: 1, kind: input, shape index: {}]   ;;  %s1211_s2 = inlined_call_operand.vmem [shape: f32[1,128], index: 2, kind: input, shape index: {}]   ;;  %s1212_s3 = inlined_call_operand.vmem [shape: f32[1,128], index: 3, kind: input, shape index: {}]   ;;  %s1213_s4 = inlined_call_operand.vmem [shape: f32[1,128], index: 4, kind: input, shape index: {}]   ;;  %s1214_s5 = inlined_call_operand.vmem [shape: f32[2,16,128], index: 5, kind: output, shape index: {0}]   ;;  %s1215_s6 = inlined_call_operand.vmem [shape: f32[2,1,128], index: 6, kind: output, shape index: {1}]   ;;  %s1216_s7 = inlined_call_operand.vmem [shape: f32[2,1,128], index: 7, kind: output, shape index: {2}]  }
   0x1 LB: > { %s745_s25 = sadd.s32 4294967295, %s969_s24   ;;  %p749_p0 = scmp.ge.s32.totalorder %s969_s24, 1  ;;  %s969_s24 = sphi %s1011_s24, %s18_s24  }
   0x2   : > { %p242_p1 = scmp.lt.s32.totalorder %s969_s24, 3 }
   0x4   : > { %p243_p2 = pnand %p749_p0, %p242_p1 }
   0x5   : > { %p280_p3 = scmp.lt.s32.totalorder (!%p243_p2), %s745_s25, 1 }
   0x6   : > { %246 = sbr.rel (%p243_p2) target bundleno = 294 (0x126), region = 40 }
   0xb   : > { %v771_v0 = vld [vmem:[%s1210_s1 + $0xf8] sm:$0xff]  ;;  %v770_v2 = vld [vmem:[%s1210_s1 + $0xf0] sm:$0xff]  ;;  %v769_v4 = vld [vmem:[%s1210_s1 + $0xe8] sm:$0xff]  ;;  %s1218_s25 = smov (!%p280_p3, %s745_s25), 1  ;;  %vm320_vm0 = vcmask 1040384   ;;  %vm327_vm1 = vcmask 1046528  }
   0xc   : > { %v349_v1 = vld [vmem:[%s1210_s1 + $0x78] sm:$0xff]  ;;  %850 = vmatprep.subr.mxu0 %v771_v0  ;;  %v348_v3 = vld [vmem:[%s1210_s1 + $0x70] sm:$0xff]  ;;  %v347_v5 = vld [vmem:[%s1210_s1 + $0x68] sm:$0xff]  ;;  %s794_s23 = sshll.u32 %s1218_s25, 4  ;;  %s292_s12 = scalar_lea.vmem %s1215_s6, %s1218_s25 }
   0xd   : > { %885 = vmatprep.subr.mxu1 %v349_v1  ;;  %851 = vmatpush3.msra.mxu0 %v771_v0  ;;  %v768_v6 = vld [vmem:[%s1210_s1 + $0xe0] sm:$0xff]  ;;  %v767_v8 = vld [vmem:[%s1210_s1 + $0xd8] sm:$0xff]  ;;  %v766_v10 = vld [vmem:[%s1210_s1 + $0xd0] sm:$0xff]  ;;  %s284_s9 = scalar_lea.vmem %s1209_s0, %s794_s23  ;;  %s289_s10 = scalar_lea.vmem %s1214_s5, %s794_s23 }
   0xe   : > { %886 = vmatpush3.msra.mxu1 %v349_v1  ;;  %852 = vmatprep.subr.mxu0 %v770_v2  ;;  %v346_v7 = vld [vmem:[%s1210_s1 + $0x60] sm:$0xff]  ;;  %v345_v9 = vld [vmem:[%s1210_s1 + $0x58] sm:$0xff]  ;;  %v344_v11 = vld [vmem:[%s1210_s1 + $0x50] sm:$0xff]  ;;  %s295_s15 = scalar_lea.vmem %s1216_s7, %s1218_s25 }
   0xf   : > { %887 = vmatprep.subr.mxu1 %v348_v3  ;;  %853 = vmatpush3.msra.mxu0 %v770_v2  ;;  %v765_v12 = vld [vmem:[%s1210_s1 + $0xc8] sm:$0xff]  ;;  %v764_v14 = vld [vmem:[%s1210_s1 + $0xc0] sm:$0xff]  ;;  %v763_v19 = vld [vmem:[%s1210_s1 + $0xb8] sm:$0xff] }
  0x10   : > { %888 = vmatpush3.msra.mxu1 %v348_v3  ;;  %854 = vmatprep.subr.mxu0 %v769_v4  ;;  %v343_v13 = vld [vmem:[%s1210_s1 + $0x48] sm:$0xff]  ;;  %v342_v15 = vld [vmem:[%s1210_s1 + $0x40] sm:$0xff]  ;;  %v341_v20 = vld [vmem:[%s1210_s1 + $0x38] sm:$0xff] }
  0x11   : > { %889 = vmatprep.subr.mxu1 %v347_v5  ;;  %855 = vmatpush3.msra.mxu0 %v769_v4  ;;  %v296_v16 = vld [vmem:[%s284_s9] sm:$0xff]  ;;  %v297_v18 = vld [vmem:[%s284_s9 + $0x8] sm:$0xff]  ;;  %v762_v23 = vld [vmem:[%s1210_s1 + $0xb0] sm:$0xff] }
  0x12   : > { %890 = vmatpush3.msra.mxu1 %v347_v5  ;;  %856 = vmatprep.subr.mxu0 %v768_v6  ;;  %v754_v17 = vld [vmem:[%s1212_s3] ss:$0 sm:$0xff]  ;;  %v340_v24 = vld [vmem:[%s1210_s1 + $0x30] sm:$0xff]  ;;  %v761_v26 = vld [vmem:[%s1210_s1 + $0xa8] sm:$0xff] }
  0x13   : > { %891 = vmatprep.subr.mxu1 %v346_v7  ;;  %857 = vmatpush3.msra.mxu0 %v768_v6  ;;  %v305_v21 = vmul.f32 %v754_v17, %v296_v16  ;;  %v306_v22 = vmul.f32 %v754_v17, %v297_v18  ;;  %v755_v25 = vld [vmem:[%s1213_s4] ss:$0 sm:$0xff]  ;;  %v339_v27 = vld [vmem:[%s1210_s1 + $0x28] sm:$0xff]  ;;  %v759_v32 = vld [vmem:[%s1210_s1 + $0x98] sm:$0xff] }
  0x14   : > { %892 = vmatpush3.msra.mxu1 %v346_v7  ;;  %858 = vmatprep.subr.mxu0 %v767_v8  ;;  %v760_v30 = vld [vmem:[%s1210_s1 + $0xa0] sm:$0xff]  ;;  %v337_v33 = vld [vmem:[%s1210_s1 + $0x18] sm:$0xff]  ;;  %v758_v36 = vld [vmem:[%s1210_s1 + $0x90] sm:$0xff] }
  0x15   : > { %893 = vmatprep.subr.mxu1 %v345_v9  ;;  %859 = vmatpush3.msra.mxu0 %v767_v8  ;;  %v314_v28 = vadd.f32 %v755_v25, %v305_v21  ;;  %v315_v29 = vadd.f32 %v755_v25, %v306_v22  ;;  %v338_v31 = vld [vmem:[%s1210_s1 + $0x20] sm:$0xff]  ;;  %v336_v37 = vld [vmem:[%s1210_s1 + $0x10] sm:$0xff]  ;;  %v757_v38 = vld [vmem:[%s1210_s1 + $0x88] sm:$0xff] }
  0x16   : > { %894 = vmatpush3.msra.mxu1 %v345_v9  ;;  %860 = vmatprep.subr.mxu0 %v766_v10  ;;  %v335_v39 = vld [vmem:[%s1210_s1 + $0x8] sm:$0xff]  ;;  %v756_v42 = vld [vmem:[%s1210_s1 + $0x80] sm:$0xff]  ;;  %vm772_vm2 = vmneg %vm320_vm0 }
  0x17   : > { %895 = vmatprep.subr.mxu1 %v344_v11  ;;  %861 = vmatpush3.msra.mxu0 %v766_v10  ;;  %v316_v34 = vmax.f32 %v314_v28, 0.0  ;;  %v1111_v35 = vmax.f32 %v315_v29, 0.0  ;;  %v334_v43 = vld [vmem:[%s1210_s1] sm:$0xff]  ;;  %v789_v47 = vld [vmem:[%s1210_s1 + $0x178] sm:$0xff]  ;;  %v788_v49 = vld [vmem:[%s1210_s1 + $0x170] sm:$0xff] }
  0x18   : > { %896 = vmatpush3.msra.mxu1 %v344_v11  ;;  %862 = vmatprep.subr.mxu0 %v765_v12  ;;  %v787_v50 = vld [vmem:[%s1210_s1 + $0x168] sm:$0xff]  ;;  %v786_v51 = vld [vmem:[%s1210_s1 + $0x160] sm:$0xff]  ;;  %v785_v52 = vld [vmem:[%s1210_s1 + $0x158] sm:$0xff] }
  0x19   : > { %897 = vmatprep.subr.mxu1 %v343_v13  ;;  %863 = vmatpush3.msra.mxu0 %v765_v12  ;;  %v321_v40 = vrot.slane %v316_v34, 7  ;;  %v322_v41 = vrot.slane %v1111_v35, 7  ;;  %v328_v44 = vrot.slane %v316_v34, 1  ;;  %v329_v45 = vrot.slane %v1111_v35, 1  ;;  %v784_v53 = vld [vmem:[%s1210_s1 + $0x150] sm:$0xff]  ;;  %v783_v54 = vld [vmem:[%s1210_s1 + $0x148] sm:$0xff] }
  0x1a   : > { %898 = vmatpush3.msra.mxu1 %v343_v13  ;;  %864 = vmatprep.subr.mxu0 %v764_v14  ;;  %v782_v55 = vld [vmem:[%s1210_s1 + $0x140] sm:$0xff]  ;;  %v781_v56 = vld [vmem:[%s1210_s1 + $0x138] sm:$0xff]  ;;  %v780_v57 = vld [vmem:[%s1210_s1 + $0x130] sm:$0xff] }
  0x1b   : > { %899 = vmatprep.subr.mxu1 %v342_v15  ;;  %865 = vmatpush3.msra.mxu0 %v764_v14  ;;  %v323_v46 = vsel %vm320_vm0, %v321_v40, %v322_v41  ;;  %v330_v48 = vsel %vm327_vm1, %v328_v44, %v329_v45  ;;  %v779_v58 = vld [vmem:[%s1210_s1 + $0x128] sm:$0xff]  ;;  %v778_v59 = vld [vmem:[%s1210_s1 + $0x120] sm:$0xff]  ;;  %v777_v60 = vld [vmem:[%s1210_s1 + $0x118] sm:$0xff] }
  0x1c   : > { %900 = vmatpush3.msra.mxu1 %v342_v15  ;;  %866 = vmatprep.subr.mxu0 %v763_v19  ;;  %v776_v61 = vld [vmem:[%s1210_s1 + $0x110] sm:$0xff]  ;;  %v775_v62 = vld [vmem:[%s1210_s1 + $0x108] sm:$0xff]  ;;  %v774_v63 = vld [vmem:[%s1210_s1 + $0x100] sm:$0xff] }
  0x1d   : > { %901 = vmatprep.subr.mxu1 %v341_v20  ;;  %867 = vmatpush3.msra.mxu0 %v763_v19  ;;  %v791_v6 = vld [vmem:[%s1211_s2] ss:$0 sm:$0xff] }
  0x1e   : > { %902 = vmatpush3.msra.mxu1 %v341_v20  ;;  %868 = vmatprep.subr.mxu0 %v762_v23 }
  0x1f   : > { %903 = vmatprep.subr.mxu1 %v340_v24  ;;  %869 = vmatpush3.msra.mxu0 %v762_v23 }
  0x20   : > { %904 = vmatpush3.msra.mxu1 %v340_v24  ;;  %870 = vmatprep.subr.mxu0 %v761_v26 }
  0x21   : > { %905 = vmatprep.subr.mxu1 %v339_v27  ;;  %871 = vmatpush3.msra.mxu0 %v761_v26 }
  0x22   : > { %906 = vmatpush3.msra.mxu1 %v339_v27  ;;  %872 = vmatprep.subr.mxu0 %v760_v30 }
  0x23   : > { %907 = vmatprep.subr.mxu1 %v338_v31  ;;  %873 = vmatpush3.msra.mxu0 %v760_v30 }
  0x24   : > { %908 = vmatpush3.msra.mxu1 %v338_v31  ;;  %874 = vmatprep.subr.mxu0 %v759_v32 }
  0x25   : > { %909 = vmatprep.subr.mxu1 %v337_v33  ;;  %875 = vmatpush3.msra.mxu0 %v759_v32 }
  0x26   : > { %910 = vmatpush3.msra.mxu1 %v337_v33  ;;  %876 = vmatprep.subr.mxu0 %v758_v36 }
  0x27   : > { %911 = vmatprep.subr.mxu1 %v336_v37  ;;  %877 = vmatpush3.msra.mxu0 %v758_v36 }
  0x28   : > { %912 = vmatpush3.msra.mxu1 %v336_v37  ;;  %878 = vmatprep.subr.mxu0 %v757_v38 }
  0x29   : > { %913 = vmatprep.subr.mxu1 %v335_v39  ;;  %879 = vmatpush3.msra.mxu0 %v757_v38 }
  0x2a   : > { %914 = vmatpush3.msra.mxu1 %v335_v39  ;;  %880 = vmatprep.subr.mxu0 %v756_v42 }
  0x2b   : > { %915 = vmatprep.subr.mxu1 %v334_v43  ;;  %881 = vmatpush3.msra.mxu0 %v756_v42 }
  0x2c   : > { %882 = vmatprep.mubr.f32.mxu0 %v316_v34  ;;  %916 = vmatpush3.msra.mxu1 %v334_v43 }
  0x2d   : > { %917 = vmatprep.mubr.msk.f32.mxu1 %vm772_vm2, %v321_v40  ;;  %883 = vmatmul.mubr.f32.vlgmr.msra.gmra.mxu0 %v1111_v35 }
  0x2e   : > { %918 = vmatmul.mubr.f32.vlgmr.msra.gmra.mxu1 %v323_v46  ;;  %920 = vmatprep.subr.mxu0 %v789_v47 }
  0x2f   : > { %952 = vmatprep.mubr.f32.mxu0 %v330_v48  ;;  %921 = vmatpush3.msra.mxu0 %v789_v47 }
  0x30   : > { %922 = vmatprep.subr.mxu0 %v788_v49 }
  0x31   : > { %923 = vmatpush3.msra.mxu0 %v788_v49 }
  0x32   : > { %924 = vmatprep.subr.mxu0 %v787_v50 }
  0x33   : > { %925 = vmatpush3.msra.mxu0 %v787_v50 }
  0x34   : > { %926 = vmatprep.subr.mxu0 %v786_v51 }
  0x35   : > { %927 = vmatpush3.msra.mxu0 %v786_v51 }
  0x36   : > { %928 = vmatprep.subr.mxu0 %v785_v52 }
  0x37   : > { %929 = vmatpush3.msra.mxu0 %v785_v52 }
  0x38   : > { %930 = vmatprep.subr.mxu0 %v784_v53 }
  0x39   : > { %931 = vmatpush3.msra.mxu0 %v784_v53 }
  0x3a   : > { %932 = vmatprep.subr.mxu0 %v783_v54 }
  0x3b   : > { %933 = vmatpush3.msra.mxu0 %v783_v54 }
  0x3c   : > { %934 = vmatprep.subr.mxu0 %v782_v55 }
  0x3d   : > { %935 = vmatpush3.msra.mxu0 %v782_v55 }
  0x3e   : > { %936 = vmatprep.subr.mxu0 %v781_v56 }
  0x3f   : > { %937 = vmatpush3.msra.mxu0 %v781_v56 }
  0x40   : > { %938 = vmatprep.subr.mxu0 %v780_v57 }
  0x41   : > { %939 = vmatpush3.msra.mxu0 %v780_v57 }
  0x42   : > { %940 = vmatprep.subr.mxu0 %v779_v58 }
  0x43   : > { %941 = vmatpush3.msra.mxu0 %v779_v58 }
  0x44   : > { %942 = vmatprep.subr.mxu0 %v778_v59 }
  0x45   : > { %943 = vmatpush3.msra.mxu0 %v778_v59 }
  0x46   : > { %944 = vmatprep.subr.mxu0 %v777_v60 }
  0x47   : > { %945 = vmatpush3.msra.mxu0 %v777_v60 }
  0x48   : > { %946 = vmatprep.subr.mxu0 %v776_v61 }
  0x49   : > { %947 = vmatpush3.msra.mxu0 %v776_v61 }
  0x4a   : > { %948 = vmatprep.subr.mxu0 %v775_v62 }
  0x4b   : > { %949 = vmatpush3.msra.mxu0 %v775_v62 }
  0x4c   : > { %950 = vmatprep.subr.mxu0 %v774_v63 }
  0x4d   : > { %951 = vmatpush3.msra.mxu0 %v774_v63 }
  0x4e   : > { %953 = vmatmul.mubr.msk.f32.vlgmr.msra.gmra.mxu0 %vm327_vm1, %v329_v45 }
  0xed   : > { %v884_v0 = vpop.f32.mrf.mxu0 }
  0xee   : > { %v919_v1 = vpop.f32.mrf.mxu1 }
  0xef   : > { %v433_v2 = vpop.f32.mrf.mxu0  ;;  %v514_v4 = vadd.f32 %v919_v1, %v884_v0 }
  0xf0   : > { %v508_v3 = vpop.f32.mrf.mxu1 }
  0xf1   : > { %v509_v7 = vadd.f32 %v508_v3, %v433_v2 }
 0x10e   : > { %v954_v5 = vpop.f32.mrf.mxu0 }
 0x10f   : > { %v610_v8 = vadd.f32 %v954_v5, %v514_v4 }
 0x110   : > { %v600_v9 = vpop.f32.mrf.mxu0 }
 0x111   : > { %v619_v10 = vadd.f32 %v791_v6, %v610_v8  ;;  %v609_v11 = vadd.f32 %v600_v9, %v509_v7 }
 0x113   : > { %639 = vst [vmem:[%s289_s10 + $0x8] sm:$0xff] %v619_v10  ;;  %v618_v12 = vadd.f32 %v791_v6, %v609_v11  ;;  %v629_v13 = vmul.f32 %v619_v10, %v619_v10 }
 0x115   : > { %v620_v14 = vadd.f32 %v619_v10, %v618_v12  ;;  %v628_v15 = vmul.f32 %v618_v12, %v618_v12  ;;  %638 = vst [vmem:[%s289_s10] sm:$0xff] %v618_v12 }
 0x117   : > { %v621_v16 = vrot.slane %v620_v14, 4  ;;  %v630_v17 = vadd.f32 %v629_v13, %v628_v15 }
 0x119   : > { %v622_v18 = vadd.f32 %v621_v16, %v620_v14  ;;  %v631_v19 = vrot.slane %v630_v17, 4 }
 0x11b   : > { %v623_v20 = vrot.slane %v622_v18, 2  ;;  %v632_v21 = vadd.f32 %v631_v19, %v630_v17 }
 0x11d   : > { %v624_v22 = vadd.f32 %v623_v20, %v622_v18  ;;  %v633_v23 = vrot.slane %v632_v21, 2 }
 0x11f   : > { %v625_v24 = vrot.slane %v624_v22, 1  ;;  %v634_v25 = vadd.f32 %v633_v23, %v632_v21 }
 0x121   : > { %v626_v26 = vadd.f32 %v625_v24, %v624_v22  ;;  %v635_v27 = vrot.slane %v634_v25, 1 }
 0x123   : > { %627 = vst [vmem:[%s292_s12] sm:$0x1] %v626_v26  ;;  %v636_v28 = vadd.f32 %v635_v27, %v634_v25 }
 0x125   : > { %637 = vst [vmem:[%s295_s15] sm:$0x1] %v636_v28 }
 0x126 PF: > { %s18_s24 = sadd.s32 1, %s969_s24  }
 0x127   : > { %p15_p4 = scmp.ge.s32.totalorder %s18_s24, 4  }
 0x129   :  { %17 = sbr.rel (!%p15_p4) target bundleno = 1 (0x1), region = 96 }

// kernel: double_conv.5
= control target key start
LH: loop header
LB: loop body
LE: loop exit
PB: predicated region body
PF: predicated region fallthrough
CT: control target
= control target key end

     0   :  { %s301_s12 = smov 0   ;;  %s318_s0 = inlined_call_operand.vmem [shape: f32[2,16,128], index: 0, kind: input, shape index: {}]   ;;  %s319_s1 = inlined_call_operand.vmem [shape: f32[1,128], index: 1, kind: input, shape index: {}]   ;;  %s320_s2 = inlined_call_operand.vmem [shape: f32[1,128], index: 2, kind: input, shape index: {}]   ;;  %s321_s3 = inlined_call_operand.vmem [shape: f32[2,16,128], index: 3, kind: output, shape index: {}]  }
   0x1 LB: > { %s250_s13 = sadd.s32 4294967295, %s279_s12   ;;  %p254_p0 = scmp.ge.s32.totalorder %s279_s12, 1  ;;  %s279_s12 = sphi %s301_s12, %s13_s12  }
   0x2   : > { %p137_p1 = scmp.lt.s32.totalorder %s279_s12, 3 }
   0x4   : > { %p138_p2 = pnand %p254_p0, %p137_p1 }
   0x5   : > { %p161_p3 = scmp.lt.s32.totalorder (!%p138_p2), %s250_s13, 1 }
   0x6   : > { %141 = sbr.rel (%p138_p2) target bundleno = 22 (0x16), region = 32 }
   0xb   : > { %s323_s13 = smov (!%p161_p3, %s250_s13), 1  ;;  %v259_v0 = vld [vmem:[%s319_s1] ss:$0 sm:$0xff] }
   0xc   : > { %s263_s14 = sshll.u32 %s323_s13, 4  ;;  %v260_v3 = vld [vmem:[%s320_s2] ss:$0 sm:$0xff] }
   0xd   : > { %s165_s19 = scalar_lea.vmem %s318_s0, %s263_s14  ;;  %s170_s24 = scalar_lea.vmem %s321_s3, %s263_s14 }
   0xe   : > { %v171_v1 = vld [vmem:[%s165_s19] sm:$0xff]  ;;  %v172_v2 = vld [vmem:[%s165_s19 + $0x8] sm:$0xff] }
   0xf   : > { %v180_v4 = vmul.f32 %v259_v0, %v171_v1  ;;  %v181_v5 = vmul.f32 %v259_v0, %v172_v2 }
  0x11   : > { %v189_v6 = vadd.f32 %v260_v3, %v180_v4  ;;  %v190_v7 = vadd.f32 %v260_v3, %v181_v5 }
  0x13   : > { %v191_v8 = vmax.f32 %v189_v6, 0.0  ;;  %v192_v9 = vmax.f32 %v190_v7, 0.0 }
  0x15   : > { %193 = vst [vmem:[%s170_s24] sm:$0xff] %v191_v8  ;;  %194 = vst [vmem:[%s170_s24 + $0x8] sm:$0xff] %v192_v9 }
  0x16 PF: > { %s13_s12 = sadd.s32 1, %s279_s12  }
  0x17   : > { %p10_p4 = scmp.ge.s32.totalorder %s13_s12, 4  }
  0x19   :  { %12 = sbr.rel (!%p10_p4) target bundleno = 1 (0x1), region = 62 }

</bundles_post_ra>
